<compile_context>
chip_gen: v7x
topology: tpu7x:2x2x1
jax: 0.10.0
libtpu: 0.0.40
codegen_flags: <defaults>
</compile_context>

<pallas_src>
import jax
import jax.numpy as jnp
from jax.experimental import pallas as pl
from jax.experimental.pallas import tpu as pltpu


def _copy_kernel(x_ref, o_ref):
    # Identity copy of the current (block_rows, lanes) tile.
    o_ref[...] = x_ref[...]


def _vmem_capacity_bytes():
    """Physical VMEM per TensorCore, with a conservative fallback."""
    try:
        info = pltpu.get_tpu_info()
        cap = getattr(info, "vmem_capacity_bytes", None)
        if cap:
            return int(cap)
    except Exception:
        pass
    return 64 * 1024 * 1024  # v7x-sized conservative default


def _resolve_view_shape(x, target_shape):
    """torch .view(x.size(0), *target_shape) shape resolution (single -1 ok)."""
    b = x.shape[0]
    flat = 1
    for d in x.shape[1:]:
        flat *= d

    target_shape = tuple(int(d) for d in target_shape)
    if -1 in target_shape:
        assert target_shape.count(-1) == 1, "only one -1 allowed in view shape"
        known = 1
        for d in target_shape:
            if d != -1:
                known *= d
        assert flat % known == 0, f"cannot infer -1: {flat} not divisible by {known}"
        target_shape = tuple(flat // known if d == -1 else d for d in target_shape)

    tgt_flat = 1
    for d in target_shape:
        tgt_flat *= d
    assert tgt_flat == flat, (
        f"cannot view {x.shape} as ({b}, {target_shape}): element count mismatch"
    )
    return (b,) + target_shape, b * flat


def pallas_reshape(
    x,
    target_shape,
    *,
    max_lane_width=32768,
    use_pallas_copy=True,
    min_pallas_bytes=2 * 1024 * 1024,
):
    """Equivalent of torch `x.view(x.size(0), *target_shape)`.

    x            : jnp array of shape (B, ...)  (contiguous / row-major)
    target_shape : tuple of ints for the trailing dims of the output
                   (supports a single -1, like torch .view)
    """
    out_shape, total = _resolve_view_shape(x, target_shape)
    itemsize = jnp.dtype(x.dtype).itemsize

    # Preferred path: contiguous row-major reshape is metadata-only (free).
    if not use_pallas_copy:
        return x.reshape(out_shape)

    # Small-input bailout: kernel launch + DMA setup dwarfs the copy.
    if total * itemsize < min_pallas_bytes:
        return x.reshape(out_shape)

    # Widest lane width L (multiple of 128, <= cap) dividing `total`.
    lanes = 0
    cand = 128
    while cand <= max_lane_width:
        if total % cand == 0:
            lanes = cand
        cand += 128
    if lanes == 0:
        # Too small / awkward to tile lane-densely; the reshape is free anyway.
        return x.reshape(out_shape)

    rows = total // lanes

    # Generation-aware block sizing from physical VMEM.
    vmem_cap = _vmem_capacity_bytes()
    if vmem_cap >= 96 * 1024 * 1024:        # 128 MiB parts: v5e / v6e
        target_block_bytes = 16 * 1024 * 1024
        vmem_limit_cap = 96 * 1024 * 1024
    else:                                    # 64 MiB parts: v7x
        target_block_bytes = 8 * 1024 * 1024
        vmem_limit_cap = 48 * 1024 * 1024

    # Dtype-aware sublane packing multiple: 8 (f32) / 16 (bf16) / 32 (int8,fp8).
    sublane = 8 * max(1, 4 // itemsize)

    rows_per_block = max(1, target_block_bytes // (lanes * itemsize))
    if rows_per_block >= rows:
        # Slab fits one block; still split in two (if cleanly possible) so a
        # "parallel" grid axis can feed both v7x TensorCores.
        half = rows // 2
        if rows >= 2 * sublane and rows % 2 == 0 and half % sublane == 0:
            block_rows = half
        else:
            block_rows = rows  # full extent -> always a legal block shape
    else:
        block_rows = max(sublane, (rows_per_block // sublane) * sublane)
        block_rows = min(block_rows, rows)
        # Prefer a block_rows that divides rows evenly (no masked tail block).
        cand_rows = block_rows
        while cand_rows >= sublane and rows % cand_rows != 0:
            cand_rows -= sublane
        if cand_rows >= sublane:
            block_rows = cand_rows

    grid = (pl.cdiv(rows, block_rows),)
    block_bytes = block_rows * lanes * itemsize
    # in + out, double-buffered => 4 live buffers; 6x gives headroom for
    # compiler-internal scratch while staying under the per-generation cap.
    vmem_limit = int(min(vmem_limit_cap, max(16 * 1024 * 1024, 6 * block_bytes)))

    x2d = x.reshape(rows, lanes)  # glue: row-major flatten (metadata only)

    out2d = pl.pallas_call(
        _copy_kernel,
        out_shape=jax.ShapeDtypeStruct((rows, lanes), x.dtype),
        grid_spec=pltpu.PrefetchScalarGridSpec(
            num_scalar_prefetch=0,
            grid=grid,
            in_specs=[pl.BlockSpec((block_rows, lanes), lambda i: (i, 0))],
            out_specs=pl.BlockSpec((block_rows, lanes), lambda i: (i, 0)),
        ),
        compiler_params=pltpu.CompilerParams(
            dimension_semantics=("parallel",),
            vmem_limit_bytes=vmem_limit,
        ),
        cost_estimate=pl.CostEstimate(
            flops=0,
            transcendentals=0,
            bytes_accessed=2 * total * itemsize,
        ),
    )(x2d)

    return out2d.reshape(out_shape)  # glue: final view shape (metadata only)


if __name__ == "__main__":
    key = jax.random.PRNGKey(0)

    # Small NCHW input consistent with the module: (B, C, H, W) = (2, 4, 16, 16)
    x = jax.random.normal(key, (2, 4, 16, 16), dtype=jnp.float32)

    # Reshape(8, 128): view (2, 4, 16, 16) -> (2, 8, 128)   (4*16*16 == 8*128)
    target_shape = (8, 128)
    ref = x.reshape(x.shape[0], *target_shape)

    # 1) Pallas copy-kernel path (min_pallas_bytes=0 forces the kernel even
    #    for this tiny demo input).
    out = pallas_reshape(x, target_shape, use_pallas_copy=True, min_pallas_bytes=0)
    out = jax.block_until_ready(out)
    assert out.shape == (2, 8, 128), out.shape
    assert out.dtype == x.dtype
    assert bool(jnp.all(out == ref))

    # 2) Default behavior: tiny input takes the automatic metadata-only bailout.
    out_bail = jax.block_until_ready(pallas_reshape(x, target_shape))
    assert bool(jnp.all(out_bail == ref))

    # 3) Explicit metadata-only fast path (production default when no kernel
    #    is strictly required).
    out_fast = jax.block_until_ready(
        pallas_reshape(x, target_shape, use_pallas_copy=False)
    )
    assert bool(jnp.all(out_fast == ref))

    # 4) Dtype-aware path: bf16 with a -1 dim in the view shape.
    xb = x.astype(jnp.bfloat16)
    out_bf16 = jax.block_until_ready(
        pallas_reshape(xb, (8, -1), use_pallas_copy=True, min_pallas_bytes=0)
    )
    ref_bf16 = xb.reshape(xb.shape[0], 8, 128)
    assert out_bf16.shape == (2, 8, 128) and out_bf16.dtype == jnp.bfloat16
    assert bool(jnp.all(out_bf16 == ref_bf16))

    print("KERNEL_OK")
</pallas_src>

<mosaic_0001>
module attributes {stable_mosaic.version = 11 : i64} {
  func.func @_copy_kernel(%arg0: i32, %arg1: memref<1x2048xf32, #tpu.memory_space<vmem>>, %arg2: memref<1x2048xf32, #tpu.memory_space<vmem>>) attributes {dimension_semantics = [#tpu.dimension_semantics<parallel>], iteration_bounds = array<i64: 1>, scalar_prefetch = 0 : i64, scratch_operands = 0 : i64, tpu.core_type = #tpu.core_type<tc>, window_params = [{transform_indices = @transform_0, window_bounds = array<i64: 1, 2048>}, {transform_indices = @transform_1, window_bounds = array<i64: 1, 2048>}]} {
    %c0 = arith.constant 0 : index
    %c0_0 = arith.constant 0 : index
    %0 = vector.load %arg1[%c0, %c0_0] : memref<1x2048xf32, #tpu.memory_space<vmem>>, vector<1x2048xf32>
    %c0_1 = arith.constant 0 : index
    %c0_2 = arith.constant 0 : index
    %1 = vector.load %arg2[%c0_1, %c0_2] : memref<1x2048xf32, #tpu.memory_space<vmem>>, vector<1x2048xf32>
    tpu.vector_store %arg2[%c0_1, %c0_2], %0 {strides = array<i32>} : memref<1x2048xf32, #tpu.memory_space<vmem>>, vector<1x2048xf32>,
    return
  }
  func.func @transform_0(%arg0: i32) -> (i32, i32) {
    %c0_i32 = arith.constant 0 : i32
    %c0_i32_0 = arith.constant 0 : i32
    return %arg0, %c0_i32 : i32, i32
  }
  func.func @transform_1(%arg0: i32) -> (i32, i32) {
    %c0_i32 = arith.constant 0 : i32
    %c0_i32_0 = arith.constant 0 : i32
    return %arg0, %c0_i32 : i32, i32
  }
}

</mosaic_0001>

<bundles_post_ra>
// kernel: tpu_custom_call.1
= control target key start
LH: loop header
LB: loop body
LE: loop exit
PB: predicated region body
PF: predicated region fallthrough
CT: control target
= control target key end

     0   :  { %6 = vsyncpa [#allocation3], 0  ;;  %s126_s0 = inlined_call_operand.hbm [shape: f32[1,2048], index: 0, kind: input, shape index: {}]   ;;  %s127_s1 = inlined_call_operand.hbm [shape: f32[1,2048], index: 1, kind: output, shape index: {}]  }
   0x1   :  { %7 = vsyncpa [#allocation4], 0  ;;  %s90_s6 = smov [#allocation2]   ;;  %s42_s10 = scalar_lea.hbm %s126_s0, 256 }
   0x2   :  { %s14_s7 = sshll.u32 %s90_s6, 4  ;;  %p43_p0 = scmp.ne.s32.totalorder %s126_s0, %s42_s10  ;;  %s15_s7 = int_to_ptr.vmem [resolvable:$true] %s14_s7 }
   0x3   :  { %p46_p1 = scmp.lt.u32.totalorder %s42_s10, %s126_s0 }
   0x5   :  { %p48_p2 = pnand %p46_p1, %p43_p0 }
   0x7   :  { %51 = shalt.err (!%p48_p2)
}
   0x8   :  { %s52_s15 = scalar_lea.vmem %s15_s7, 256  ;;  %p57_p4 = scmp.lt.s32.totalorder %s15_s7, %s15_s7 }
   0x9   :  { %p53_p3 = scmp.ne.s32.totalorder %s15_s7, %s52_s15  ;;  %p58_p5 = scmp.lt.s32.totalorder %s52_s15, %s52_s15 }
   0xb   :  { %p59_p6 = por %p58_p5, %p57_p4 }
   0xd   :  { %p60_p7 = pnand %p59_p6, %p53_p3 }
   0xf   :  { %63 = shalt.err (!%p60_p7)
}
  0x10   :  { %17 = dma.hbm_to_vmem [thread:$0]  %s126_s0, 256, %s15_s7, [#allocation3]  }
  0x11   :  { %86 = dma.done.wait [#allocation3], 256  }
  0x12   :  { %87 = vsyncadd [#allocation3], 4294967040  ;;  %s91_s18 = smov [#allocation5]   ;;  %v21_v0 = vld [vmem:[#allocation2] sm:$0xff]  ;;  %v22_v1 = vld [vmem:[#allocation2 + $0x8] sm:$0xff] }
  0x13   :  { %s31_s19 = sshll.u32 %s91_s18, 4  ;;  %23 = vst [vmem:[#allocation5] sm:$0xff] %v21_v0  ;;  %24 = vst [vmem:[#allocation5 + $0x8] sm:$0xff] %v22_v1  ;;  %s32_s19 = int_to_ptr.vmem [resolvable:$true] %s31_s19 }
  0x14   :  { %s64_s20 = scalar_lea.vmem %s32_s19, 256  ;;  %p69_p9 = scmp.lt.s32.totalorder %s32_s19, %s32_s19 }
  0x15   :  { %p65_p8 = scmp.ne.s32.totalorder %s32_s19, %s64_s20  ;;  %p70_p10 = scmp.lt.s32.totalorder %s64_s20, %s64_s20 }
  0x17   :  { %p71_p11 = por %p70_p10, %p69_p9 }
  0x19   :  { %p72_p12 = pnand %p71_p11, %p65_p8 }
  0x1b   :  { %75 = shalt.err (!%p72_p12)
}
  0x1c   :  { %s76_s0 = scalar_lea.hbm %s127_s1, 256 }
  0x1d   :  { %p77_p13 = scmp.ne.s32.totalorder %s127_s1, %s76_s0  ;;  %p80_p0 = scmp.lt.u32.totalorder %s76_s0, %s127_s1 }
  0x1f   :  { %p82_p1 = pnand %p80_p0, %p77_p13 }
  0x21   :  { %85 = shalt.err (!%p82_p1)
}
  0x22   :  { %34 = dma.vmem_to_hbm [thread:$0]  %s32_s19, 256, %s127_s1, [#allocation4]  }
  0x23   :  { %88 = dma.done.wait [#allocation4], 256  }
  0x24   :  { %89 = vsyncadd [#allocation4], 4294967040 }
  0x25   :  { %38 = vsyncpa [#allocation3], 1 }
  0x26   :  { %39 = vsyncpa [#allocation4], 1 }

</bundles_post_ra>
